<compile_context>
chip_gen: v6e
topology: v6e:2x2x1
jax: 0.10.0
libtpu: 0.0.40
codegen_flags: <defaults>
</compile_context>

<pallas_src>
import jax
import jax.numpy as jnp
from jax.experimental import pallas as pl
from jax.experimental.pallas import tpu as pltpu


def _mlp_kernel(xt_ref, w1t_ref, b1_ref, w2t_ref, b2_ref, w3_ref, b3_ref, o_ref):
    """Fused 3-layer MLP in transposed layout: batch on the lane axis."""
    xt = xt_ref[...]                                                   # (D, tb) bf16
    # Layer 1: (H1, D) @ (D, tb) -> (H1, tb), f32 accumulation on the MXU.
    h1 = jnp.dot(w1t_ref[...], xt, preferred_element_type=jnp.float32)
    h1 = jnp.maximum(h1 + b1_ref[...], 0.0)                            # bias+ReLU in f32
    # Dropout (eval mode) == identity.
    # Layer 2: (H2, H1) @ (H1, tb) -> (H2, tb).
    h2 = jnp.dot(w2t_ref[...], h1.astype(jnp.bfloat16),
                 preferred_element_type=jnp.float32)
    h2 = jnp.maximum(h2 + b2_ref[...], 0.0)
    # Dropout (eval mode) == identity.
    # Layer 3 (H2 -> 1): single output column -> skip the MXU, do a VPU
    # multiply + cross-sublane reduction; result is already lane-major (1, tb).
    y = jnp.sum(h2 * w3_ref[...], axis=0, keepdims=True) + b3_ref[0, 0]
    o_ref[...] = y.astype(o_ref.dtype)                                 # (1, tb) lane-dense


def prepack_params(params):
    """One-time repack of (w1,b1,w2,b2,w3,b3) into the kernel-ready layout.

    Hoisted out of the forward so a BO loop doesn't re-dispatch 6 small XLA
    ops (transpose/cast/reshape) and re-touch the weights on every call.
    """
    w1, b1, w2, b2, w3, b3 = params
    H1 = w1.shape[1]
    H2 = w2.shape[1]
    w1t = jnp.asarray(w1).T.astype(jnp.bfloat16)          # (H1, D)  MXU operand
    b1c = jnp.asarray(b1).reshape(H1, 1).astype(jnp.float32)
    w2t = jnp.asarray(w2).T.astype(jnp.bfloat16)          # (H2, H1) MXU operand
    b2c = jnp.asarray(b2).reshape(H2, 1).astype(jnp.float32)
    w3c = jnp.asarray(w3).reshape(H2, 1).astype(jnp.float32)  # final projection column
    b3c = jnp.asarray(b3).reshape(1, 1).astype(jnp.float32)   # scalar, via SMEM
    return (w1t, b1c, w2t, b2c, w3c, b3c)


def _pick_tiling(B, tile_b=None):
    """Choose a lane-dense batch tile (multiple of 128) from the batch size."""
    B_pad128 = pl.cdiv(B, 128) * 128
    if tile_b is None:
        if B_pad128 >= 256:
            # Big tiles amortize per-step overhead; cap at 8192 lanes so the
            # working set (~4-5 MB incl. double buffers / f32 intermediates)
            # stays comfortably inside v7x's smaller VMEM.  Halving guarantees
            # num_tiles >= 2 so "parallel" can shard across v7x's two TCs.
            tile_b = max(128, min(8192, (B_pad128 // 2 // 128) * 128))
        else:
            tile_b = 128
    else:
        tile_b = max(128, (int(tile_b) // 128) * 128)
        tile_b = min(tile_b, B_pad128)
    num_tiles = pl.cdiv(B, tile_b)
    B_pad = num_tiles * tile_b
    return tile_b, num_tiles, B_pad


def mlp_surrogate_forward(x, packed, *, tile_b=None):
    """Run the fused MLP kernel on pre-packed params, tiling the batch on lanes."""
    w1t, b1c, w2t, b2c, w3c, b3c = packed
    B, D = x.shape
    H1 = w1t.shape[0]
    H2 = w2t.shape[0]

    tile_b, num_tiles, B_pad = _pick_tiling(B, tile_b)

    # Cast BEFORE transpose/pad so the transposed copy of x writes bf16 (half
    # the bytes of the old f32-transpose-then-cast path).
    xb = x.astype(jnp.bfloat16)                        # (B, D)
    if B_pad != B:
        xb = jnp.pad(xb, ((0, B_pad - B), (0, 0)))     # zero-pad extra batch rows
    xt = xb.T                                          # (D, B_pad) feature-major

    flops = 2 * B_pad * (D * H1 + H1 * H2 + H2)
    bytes_accessed = (D * B_pad * 2                    # x tile reads (bf16)
                      + (H1 * D + H2 * H1) * 2         # weights (bf16)
                      + (H1 + H2 + H2 + 1) * 4         # biases + w3 column
                      + B_pad * 4)                     # output (f32)

    out = pl.pallas_call(
        _mlp_kernel,
        out_shape=jax.ShapeDtypeStruct((1, B_pad), jnp.float32),
        grid_spec=pltpu.PrefetchScalarGridSpec(
            num_scalar_prefetch=0,
            grid=(num_tiles,),
            in_specs=[
                pl.BlockSpec((D, tile_b), lambda i: (0, i)),    # x^T tile (bf16)
                pl.BlockSpec((H1, D), lambda i: (0, 0)),        # W1^T (full, resident)
                pl.BlockSpec((H1, 1), lambda i: (0, 0)),        # b1
                pl.BlockSpec((H2, H1), lambda i: (0, 0)),       # W2^T (full, resident)
                pl.BlockSpec((H2, 1), lambda i: (0, 0)),        # b2
                pl.BlockSpec((H2, 1), lambda i: (0, 0)),        # W3 column
                pl.BlockSpec(memory_space=pltpu.MemorySpace.SMEM),  # b3 scalar
            ],
            out_specs=pl.BlockSpec((1, tile_b), lambda i: (0, i)),
        ),
        compiler_params=pltpu.CompilerParams(
            # Shards batch tiles across both v7x TensorCores (num_tiles >= 2
            # whenever B_pad >= 256 by construction of _pick_tiling).
            dimension_semantics=("parallel",),
        ),
        cost_estimate=pl.CostEstimate(
            flops=flops, transcendentals=0, bytes_accessed=bytes_accessed),
    )(xt, w1t, b1c, w2t, b2c, w3c, b3c)

    # Drop batch padding and restore the PyTorch (B, 1) output shape.
    return out[0, :B].reshape(B, 1)


def init_params(key, input_dim, hidden_dim1=64, hidden_dim2=64):
    """Deterministic parameter init mimicking nn.Linear's U(-1/sqrt(fan_in), ...)."""
    ks = jax.random.split(key, 6)

    def linear(kw, kb, fan_in, fan_out):
        bound = 1.0 / jnp.sqrt(float(fan_in))
        # Stored as (in, out) so references compute x @ W.
        w = jax.random.uniform(kw, (fan_in, fan_out), jnp.float32, -bound, bound)
        b = jax.random.uniform(kb, (1, fan_out), jnp.float32, -bound, bound)
        return w, b

    w1, b1 = linear(ks[0], ks[1], input_dim, hidden_dim1)
    w2, b2 = linear(ks[2], ks[3], hidden_dim1, hidden_dim2)
    w3, b3 = linear(ks[4], ks[5], hidden_dim2, 1)
    return (w1, b1, w2, b2, w3, b3)


def mlp_surrogate_ref(x, params):
    """Pure-JAX reference mirroring the kernel's dtype strategy (bf16 matmul
    operands, f32 accumulation / bias / ReLU)."""
    w1, b1, w2, b2, w3, b3 = params
    f32 = jnp.float32
    xb = x.astype(jnp.bfloat16).astype(f32)
    w1b = w1.astype(jnp.bfloat16).astype(f32)
    w2b = w2.astype(jnp.bfloat16).astype(f32)
    h1 = jnp.maximum(xb @ w1b + b1, 0.0)
    h1 = h1.astype(jnp.bfloat16).astype(f32)
    h2 = jnp.maximum(h1 @ w2b + b2, 0.0)
    return h2 @ w3 + b3


if __name__ == "__main__":
    key = jax.random.PRNGKey(0)
    k_param, k_x1, k_x2 = jax.random.split(key, 3)

    input_dim, hidden1, hidden2 = 20, 32, 32
    params = init_params(k_param, input_dim, hidden1, hidden2)
    packed = prepack_params(params)          # one-time weight repack

    # Small batch (typical BO surrogate query): single 128-lane tile.
    x_small = jax.random.normal(k_x1, (8, input_dim), jnp.float32)
    out_small = jax.block_until_ready(mlp_surrogate_forward(x_small, packed))
    ref_small = mlp_surrogate_ref(x_small, params)
    assert out_small.shape == (8, 1), out_small.shape
    assert jnp.allclose(out_small, ref_small, atol=1e-4, rtol=1e-4), (out_small, ref_small)

    # Larger, non-multiple-of-128 batch: exercises padding and num_tiles >= 2.
    x_large = jax.random.normal(k_x2, (300, input_dim), jnp.float32)
    out_large = jax.block_until_ready(mlp_surrogate_forward(x_large, packed))
    ref_large = mlp_surrogate_ref(x_large, params)
    assert out_large.shape == (300, 1), out_large.shape
    assert jnp.allclose(out_large, ref_large, atol=1e-4, rtol=1e-4)

    print("KERNEL_OK")
</pallas_src>

<mosaic_0001>
module attributes {stable_mosaic.version = 11 : i64} {
  func.func @_mlp_kernel(%arg0: i32, %arg1: memref<20x128xbf16, #tpu.memory_space<vmem>>, %arg2: memref<32x20xbf16, #tpu.memory_space<vmem>>, %arg3: memref<32x1xf32, #tpu.memory_space<vmem>>, %arg4: memref<32x32xbf16, #tpu.memory_space<vmem>>, %arg5: memref<32x1xf32, #tpu.memory_space<vmem>>, %arg6: memref<32x1xf32, #tpu.memory_space<vmem>>, %arg7: memref<1x1xf32, #tpu.memory_space<smem>>, %arg8: memref<1x128xf32, #tpu.memory_space<vmem>>) attributes {dimension_semantics = [#tpu.dimension_semantics<parallel>], iteration_bounds = array<i64: 1>, scalar_prefetch = 0 : i64, scratch_operands = 0 : i64, tpu.core_type = #tpu.core_type<tc>, window_params = [{transform_indices = @transform_0, window_bounds = array<i64: 20, 128>}, {pipeline_mode = #tpu.pipeline_mode<synchronous>, transform_indices = @transform_1, window_bounds = array<i64: 32, 20>}, {pipeline_mode = #tpu.pipeline_mode<synchronous>, transform_indices = @transform_2, window_bounds = array<i64: 32, 1>}, {pipeline_mode = #tpu.pipeline_mode<synchronous>, transform_indices = @transform_3, window_bounds = array<i64: 32, 32>}, {pipeline_mode = #tpu.pipeline_mode<synchronous>, transform_indices = @transform_4, window_bounds = array<i64: 32, 1>}, {pipeline_mode = #tpu.pipeline_mode<synchronous>, transform_indices = @transform_5, window_bounds = array<i64: 32, 1>}, {transform_indices = @transform_6, window_bounds = array<i64: 1, 1>}, {transform_indices = @transform_7, window_bounds = array<i64: 1, 128>}]} {
    %c0 = arith.constant 0 : index
    %c0_0 = arith.constant 0 : index
    %0 = vector.load %arg1[%c0, %c0_0] : memref<20x128xbf16, #tpu.memory_space<vmem>>, vector<20x128xbf16>
    %c0_1 = arith.constant 0 : index
    %c0_2 = arith.constant 0 : index
    %1 = vector.load %arg2[%c0_1, %c0_2] : memref<32x20xbf16, #tpu.memory_space<vmem>>, vector<32x20xbf16>
    %cst = arith.constant dense<0.000000e+00> : vector<32x128xf32>
    %2 = tpu.matmul %1, %0, %cst {dimension_numbers = #tpu.dot_dimension_numbers<[1], [0], [0], [1], [0, 0, 1, 1], [], []>} : vector<32x20xbf16>, vector<20x128xbf16>, vector<32x128xf32> -> vector<32x128xf32>
    %c0_3 = arith.constant 0 : index
    %c0_4 = arith.constant 0 : index
    %3 = vector.load %arg3[%c0_3, %c0_4] : memref<32x1xf32, #tpu.memory_space<vmem>>, vector<32x1xf32>
    %4 = vector.broadcast %3 : vector<32x1xf32> to vector<32x128xf32>
    %5 = arith.addf %2, %4 : vector<32x128xf32>
    %cst_5 = arith.constant 0.000000e+00 : f32
    %6 = vector.broadcast %cst_5 : f32 to vector<32x128xf32>
    %7 = arith.maximumf %5, %6 : vector<32x128xf32>
    %c0_6 = arith.constant 0 : index
    %c0_7 = arith.constant 0 : index
    %8 = vector.load %arg4[%c0_6, %c0_7] : memref<32x32xbf16, #tpu.memory_space<vmem>>, vector<32x32xbf16>
    %9 = arith.truncf %7 : vector<32x128xf32> to vector<32x128xbf16>
    %cst_8 = arith.constant dense<0.000000e+00> : vector<32x128xf32>
    %10 = tpu.matmul %8, %9, %cst_8 {dimension_numbers = #tpu.dot_dimension_numbers<[1], [0], [0], [1], [0, 0, 1, 1], [], []>} : vector<32x32xbf16>, vector<32x128xbf16>, vector<32x128xf32> -> vector<32x128xf32>
    %c0_9 = arith.constant 0 : index
    %c0_10 = arith.constant 0 : index
    %11 = vector.load %arg5[%c0_9, %c0_10] : memref<32x1xf32, #tpu.memory_space<vmem>>, vector<32x1xf32>
    %12 = vector.broadcast %11 : vector<32x1xf32> to vector<32x128xf32>
    %13 = arith.addf %10, %12 : vector<32x128xf32>
    %cst_11 = arith.constant 0.000000e+00 : f32
    %14 = vector.broadcast %cst_11 : f32 to vector<32x128xf32>
    %15 = arith.maximumf %13, %14 : vector<32x128xf32>
    %c0_12 = arith.constant 0 : index
    %c0_13 = arith.constant 0 : index
    %16 = vector.load %arg6[%c0_12, %c0_13] : memref<32x1xf32, #tpu.memory_space<vmem>>, vector<32x1xf32>
    %17 = vector.broadcast %16 : vector<32x1xf32> to vector<32x128xf32>
    %18 = arith.mulf %15, %17 : vector<32x128xf32>
    %cst_14 = arith.constant dense<0.000000e+00> : vector<128xf32>
    %19 = vector.multi_reduction <add>, %18, %cst_14 [0] : vector<32x128xf32> to vector<128xf32>
    %20 = vector.shape_cast %19 : vector<128xf32> to vector<1x128xf32>
    %c0_15 = arith.constant 0 : index
    %c0_16 = arith.constant 0 : index
    %21 = memref.load %arg7[%c0_15, %c0_16] : memref<1x1xf32, #tpu.memory_space<smem>>
    %22 = vector.broadcast %21 : f32 to vector<1x128xf32>
    %23 = arith.addf %20, %22 : vector<1x128xf32>
    %c0_17 = arith.constant 0 : index
    %c0_18 = arith.constant 0 : index
    %24 = vector.load %arg8[%c0_17, %c0_18] : memref<1x128xf32, #tpu.memory_space<vmem>>, vector<1x128xf32>
    tpu.vector_store %arg8[%c0_17, %c0_18], %23 {strides = array<i32>} : memref<1x128xf32, #tpu.memory_space<vmem>>, vector<1x128xf32>,
    return
  }
  func.func @transform_0(%arg0: i32) -> (i32, i32) {
    %c0_i32 = arith.constant 0 : i32
    %c0_i32_0 = arith.constant 0 : i32
    return %c0_i32, %arg0 : i32, i32
  }
  func.func @transform_1(%arg0: i32) -> (i32, i32) {
    %c0_i32 = arith.constant 0 : i32
    %c0_i32_0 = arith.constant 0 : i32
    %c0_i32_1 = arith.constant 0 : i32
    return %c0_i32, %c0_i32_0 : i32, i32
  }
  func.func @transform_2(%arg0: i32) -> (i32, i32) {
    %c0_i32 = arith.constant 0 : i32
    %c0_i32_0 = arith.constant 0 : i32
    %c0_i32_1 = arith.constant 0 : i32
    return %c0_i32, %c0_i32_0 : i32, i32
  }
  func.func @transform_3(%arg0: i32) -> (i32, i32) {
    %c0_i32 = arith.constant 0 : i32
    %c0_i32_0 = arith.constant 0 : i32
    %c0_i32_1 = arith.constant 0 : i32
    return %c0_i32, %c0_i32_0 : i32, i32
  }
  func.func @transform_4(%arg0: i32) -> (i32, i32) {
    %c0_i32 = arith.constant 0 : i32
    %c0_i32_0 = arith.constant 0 : i32
    %c0_i32_1 = arith.constant 0 : i32
    return %c0_i32, %c0_i32_0 : i32, i32
  }
  func.func @transform_5(%arg0: i32) -> (i32, i32) {
    %c0_i32 = arith.constant 0 : i32
    %c0_i32_0 = arith.constant 0 : i32
    %c0_i32_1 = arith.constant 0 : i32
    return %c0_i32, %c0_i32_0 : i32, i32
  }
  func.func @transform_6(%arg0: i32) -> (i32, i32) {
    %c0_i32 = arith.constant 0 : i32
    %c0_i32_0 = arith.constant 0 : i32
    %c0_i32_1 = arith.constant 0 : i32
    return %c0_i32, %c0_i32_0 : i32, i32
  }
  func.func @transform_7(%arg0: i32) -> (i32, i32) {
    %c0_i32 = arith.constant 0 : i32
    %c0_i32_0 = arith.constant 0 : i32
    return %c0_i32, %arg0 : i32, i32
  }
}

</mosaic_0001>

<bundles_post_ra>
// kernel: tpu_custom_call.1
= control target key start
LH: loop header
LB: loop body
LE: loop exit
PB: predicated region body
PF: predicated region fallthrough
CT: control target
= control target key end

     0   :  { %vm86_vm0 = vcmask 1041408   ;;  %vm79_vm1 = vcmask 162816   ;;  %v365_v6 = vmov 0   ;;  %s471_s0 = inlined_call_operand.vmem [shape: bf16[20,128], index: 0, kind: input, shape index: {}]   ;;  %s472_s1 = inlined_call_operand.vmem [shape: bf16[32,20], index: 1, kind: input, shape index: {}]   ;;  %s473_s2 = inlined_call_operand.vmem [shape: f32[32,1], index: 2, kind: input, shape index: {}]   ;;  %s474_s3 = inlined_call_operand.vmem [shape: bf16[32,32], index: 3, kind: input, shape index: {}]   ;;  %s475_s4 = inlined_call_operand.vmem [shape: f32[32,1], index: 4, kind: input, shape index: {}]   ;;  %s476_s5 = inlined_call_operand.vmem [shape: f32[32,1], index: 5, kind: input, shape index: {}]   ;;  %s477_s6 = inlined_call_operand.<no memory space> [shape: f32[1,1], index: 6, kind: input, shape index: {}]   ;;  %s478_s7 = inlined_call_operand.hbm [shape: f32[1,128], index: 7, kind: output, shape index: {}]  }
   0x1   :  { %v337_v0 = vld [vmem:[%s471_s0 + $0x8] ss:$0 sps:$4 sm:$0x33]   ;;  %v338_v1 = vld [vmem:[%s471_s0] sm:$0xff]   ;;  %v38_v4 = vld [vmem:[%s473_s2 + $0x10] sm:$0xff]  ;;  %335 = vset.pattern.permute.xlu0 %v365_v6  ;;  %336 = vset.pattern.permute.xlu1 %v365_v6 }
   0x2   :  { %332 = vmatprep.subr.msk.bf16.mxu0 %vm86_vm0, %v337_v0  ;;  %v88_v2 = vsel %vm86_vm0, %v337_v0, 0  ;;  %v339_v3 = vld [vmem:[%s472_s1] sm:$0xff]   ;;  %v340_v7 = vld [vmem:[%s472_s1 + $0x8] sm:$0xff]   ;;  %52 = vperm.xlu0 %335, %v38_v4   ;;  %v39_v8 = vld [vmem:[%s473_s2 + $0x18] sm:$0xff] }
   0x3   :  { %317 = vmatpush3.bf16.msra.mxu0 %v88_v2  ;;  %320 = vmatprep.mubr.msk.bf16.mxu0 %vm79_vm1, %v339_v3  ;;  %v36_v5 = vld [vmem:[%s473_s2] sm:$0xff]  ;;  %v37_v9 = vld [vmem:[%s473_s2 + $0x8] sm:$0xff] }
   0x4   :  { %318 = vmatprep.subr.bf16.mxu0 %v338_v1  ;;  %42 = vperm.xlu1 %336, %v36_v5  }
   0x7   :  { %319 = vmatpush3.bf16.msra.mxu0 %v338_v1 }
   0x8   :  { %13 = vsyncpa [#allocation4], 0  ;;  %57 = vperm.xlu0 %335, %v39_v8   ;;  %v149_v10 = vld [vmem:[%s475_s4] sm:$0xff]  ;;  %47 = vperm.xlu1 %336, %v37_v9   ;;  %v150_v11 = vld [vmem:[%s475_s4 + $0x8] sm:$0xff]  ;;  %vm183_vm2 = vcmask 261120   ;;  %v281_v6 = vstv %s477_s6  ;;  %s366_s10 = smov [#allocation3]  }
   0x9   :  { %v151_v12 = vld [vmem:[%s475_s4 + $0x10] sm:$0xff]  ;;  %v152_v13 = vld [vmem:[%s475_s4 + $0x18] sm:$0xff]  ;;  %v243_v14 = vld [vmem:[%s476_s5] sm:$0xff]  ;;  %s290_s0 = sshll.u32 %s366_s10, 4  ;;  %s291_s0 = int_to_ptr.vmem [resolvable:$true] %s290_s0 }
   0xa   :  { %321 = vmatmul.mubr.msk.bf16.vlgmr.msra.gmra.mxu0 %vm79_vm1, %v340_v7  ;;  %v244_v15 = vld [vmem:[%s476_s5 + $0x8] sm:$0xff]  ;;  %v245_v16 = vld [vmem:[%s476_s5 + $0x10] sm:$0xff]  ;;  %v246_v17 = vld [vmem:[%s476_s5 + $0x18] sm:$0xff]  ;;  %s343_s11 = scalar_lea.vmem %s291_s0, 16  ;;  %s347_s12 = scalar_lea.vmem %s291_s0, 32 }
   0xb   :  { %v341_v18 = vld [vmem:[%s474_s3] sm:$0xff]   ;;  %v342_v37 = vld [vmem:[%s474_s3 + $0x8] sm:$0xff]   ;;  %p344_p0 = scmp.ne.s32.totalorder %s291_s0, %s343_s11  ;;  %p348_p1 = scmp.lt.s32.totalorder %s291_s0, %s291_s0 }
   0xc   :  { %155 = vperm.xlu0 %335, %v149_v10   ;;  %160 = vperm.xlu1 %336, %v150_v11   ;;  %p349_p2 = scmp.lt.s32.totalorder %s347_s12, %s343_s11 }
   0xd   :  { %328 = vmatprep.mubr.msk.bf16.mxu1 %vm183_vm2, %v341_v18 }
   0xe   :  { %p350_p3 = por %p349_p2, %p348_p1 }
  0x10   :  { %165 = vperm.xlu0 %335, %v151_v12   ;;  %170 = vperm.xlu1 %336, %v152_v13   ;;  %p351_p4 = pnand %p350_p3, %p344_p0 }
  0x14   :  { %249 = vperm.xlu0 %335, %v243_v14   ;;  %254 = vperm.xlu1 %336, %v244_v15  }
  0x18   :  { %259 = vperm.xlu0 %335, %v245_v16   ;;  %264 = vperm.xlu1 %336, %v246_v17  }
  0x7d   :  { %v53_v19 = vpop.permute.xlu0 %52 }
  0x7f   :  { %v43_v20 = vpop.permute.xlu1 %42 }
  0x83   :  { %v58_v24 = vpop.permute.xlu0 %57  ;;  %v48_v28 = vpop.permute.xlu1 %47 }
  0x87   :  { %v156_v38 = vpop.permute.xlu0 %155  ;;  %v161_v39 = vpop.permute.xlu1 %160 }
  0x8b   :  { %v166_v40 = vpop.permute.xlu0 %165  ;;  %v171_v42 = vpop.permute.xlu1 %170 }
  0x8f   :  { %v250_v47 = vpop.permute.xlu0 %249  ;;  %v255_v52 = vpop.permute.xlu1 %254 }
  0x93   :  { %v260_v58 = vpop.permute.xlu0 %259  ;;  %v265_v61 = vpop.permute.xlu1 %264 }
  0xca   :  { %v322_v21 = vpop.f32.mrf.mxu0 }
  0xcb   :  { %v133_v23 = vadd.f32 %v322_v21, %v53_v19 }
  0xcc   :  { %v124_v22 = vpop.f32.mrf.mxu0 }
  0xcd   :  { %v125_v26 = vadd.f32 %v124_v22, %v43_v20  ;;  %v141_v30 = vmax.f32 %v133_v23, 0.0 }
  0xce   :  { %v323_v25 = vpop.f32.mrf.mxu0 }
  0xcf   :  { %v136_v27 = vadd.f32 %v323_v25, %v58_v24  ;;  %v139_v33 = vmax.f32 %v125_v26, 0.0 }
  0xd0   :  { %v127_v29 = vpop.f32.mrf.mxu0 }
  0xd1   :  { %v142_v31 = vmax.f32 %v136_v27, 0.0  ;;  %v128_v32 = vadd.f32 %v127_v29, %v48_v28 }
  0xd3   :  { %v140_v34 = vmax.f32 %v128_v32, 0.0  ;;  %v148_v35 = vpack.c.bf16 %v142_v31, %v141_v30 }
  0xd5   :  { %v147_v36 = vpack.c.bf16 %v140_v34, %v139_v33  ;;  %324 = vmatprep.subr.bf16.mxu1 %v148_v35 }
  0xd6   :  { %325 = vmatpush3.bf16.msra.mxu1 %v148_v35 }
  0xd7   :  { %326 = vmatprep.subr.bf16.mxu1 %v147_v36 }
  0xda   :  { %327 = vmatpush3.bf16.msra.mxu1 %v147_v36 }
  0xdd   :  { %329 = vmatmul.mubr.msk.bf16.vlgmr.msra.gmra.mxu1 %vm183_vm2, %v342_v37 }
 0x19d   :  { %v330_v41 = vpop.f32.mrf.mxu1 }
 0x19e   :  { %v233_v46 = vadd.f32 %v330_v41, %v166_v40 }
 0x19f   :  { %v224_v43 = vpop.f32.mrf.mxu1 }
 0x1a0   :  { %v225_v44 = vadd.f32 %v224_v43, %v156_v38  ;;  %v241_v53 = vmax.f32 %v233_v46, 0.0 }
 0x1a1   :  { %v331_v45 = vpop.f32.mrf.mxu1 }
 0x1a2   :  { %v239_v49 = vmax.f32 %v225_v44, 0.0  ;;  %v236_v50 = vadd.f32 %v331_v45, %v171_v42  ;;  %v269_v59 = vmul.f32 %v260_v58, %v241_v53 }
 0x1a3   :  { %v227_v48 = vpop.f32.mrf.mxu1 }
 0x1a4   :  { %v228_v51 = vadd.f32 %v227_v48, %v161_v39  ;;  %v267_v55 = vmul.f32 %v250_v47, %v239_v49  ;;  %v242_v56 = vmax.f32 %v236_v50, 0.0 }
 0x1a6   :  { %v240_v54 = vmax.f32 %v228_v51, 0.0  ;;  %v270_v62 = vmul.f32 %v265_v61, %v242_v56 }
 0x1a8   :  { %v268_v57 = vmul.f32 %v255_v52, %v240_v54 }
 0x1aa   :  { %v271_v60 = vadd.f32 %v268_v57, %v267_v55 }
 0x1ac   :  { %v272_v63 = vadd.f32 %v271_v60, %v269_v59 }
 0x1ae   :  { %v273_v0 = vadd.f32 %v272_v63, %v270_v62 }
 0x1b0   :  { %v274_v1 = vrot.slane %v273_v0, 4 }
 0x1b2   :  { %v275_v2 = vadd.f32 %v274_v1, %v273_v0 }
 0x1b4   :  { %v276_v3 = vrot.slane %v275_v2, 2 }
 0x1b6   :  { %v277_v4 = vadd.f32 %v276_v3, %v275_v2 }
 0x1b8   :  { %v278_v5 = vrot.slane %v277_v4, 1 }
 0x1ba   :  { %v279_v7 = vadd.f32 %v278_v5, %v277_v4 }
 0x1bc   :  { %v282_v8 = vadd.f32 %v281_v6, %v279_v7 }
 0x1be   :  { %283 = vst [vmem:[#allocation3] sm:$0x1] %v282_v8 }
 0x1bf   :  { %354 = shalt.err (!%p351_p4)
}
 0x1c0   :  { %293 = dma.vmem_to_hbm [thread:$0]  %s291_s0, 16, %s478_s7, [#allocation4]  }
 0x1c1   :  { %363 = dma.done.wait [#allocation4], 16  }
 0x1c2   :  { %364 = vsyncadd [#allocation4], 4294967280 }
 0x1c3   :  { %297 = vsyncpa [#allocation4], 1 }

</bundles_post_ra>
